<compile_context>
chip_gen: v7x
topology: tpu7x:2x2x1
jax: 0.10.0
libtpu: 0.0.40
codegen_flags: <defaults>
</compile_context>

<pallas_src>
import functools

import jax
import jax.numpy as jnp
from jax.experimental import pallas as pl
from jax.experimental.pallas import tpu as pltpu

# Module hyper-parameters (from the PyTorch spec).
hidDim = 10
inDim = 20
labelNum = 2
batchSize = 2

# Packed-parameter slab layout (rows x 128 lanes, all f32, zero padded).
LANE = 128
SUB = 8
K_PAD = 32                 # inDim (20) padded to a multiple of 8 (contraction dim / x lanes)
B1_ROW = K_PAD             # row 32: b1 (cols 0..hidDim-1)
WK_OFF = K_PAD + SUB       # rows 40..167: head weight Wk (hidDim x labelNum, zero padded)
BK_ROW = WK_OFF + LANE     # row 168: bk (cols 0..labelNum-1)
PROWS = BK_ROW + SUB       # 176 rows total (multiple of 8)


def _round_up(n, m):
    return ((n + m - 1) // m) * m


def _mlp_kernel(ind_ref, x_ref, p_ref, o_ref):
    # Head selection already happened in the index_map via scalar prefetch.
    del ind_ref
    w1 = p_ref[0:K_PAD, :]                 # (32, 128)  zero-padded Fc1 weight (transposed)
    b1 = p_ref[B1_ROW:B1_ROW + 1, :]       # (1, 128)   zero-padded Fc1 bias
    wk = p_ref[WK_OFF:WK_OFF + LANE, :]    # (128, 128) zero-padded head weight (transposed)
    bk = p_ref[BK_ROW:BK_ROW + 1, :]       # (1, 128)   zero-padded head bias

    h1 = jnp.dot(x_ref[...], w1, preferred_element_type=jnp.float32)
    h1 = jnp.maximum(h1 + b1, 0.0)
    out = jnp.dot(h1, wk, preferred_element_type=jnp.float32) + bk
    o_ref[...] = out.astype(o_ref.dtype)


def _testd_forward_impl(x, packed_params, ind, *, batch_tile=512):
    batch = x.shape[0]
    tb = min(batch_tile, _round_up(batch, SUB))      # batch tile (multiple of 8)
    batch_pad = _round_up(batch, tb)
    grid = (batch_pad // tb,)

    # Pad x rows to the tile grid and lanes to the padded contraction dim.
    x_pad = jnp.zeros((batch_pad, K_PAD), jnp.float32).at[:batch, :inDim].set(
        x.astype(jnp.float32)
    )
    ind_arr = jnp.asarray(ind, jnp.int32).reshape((1,))

    out_pad = pl.pallas_call(
        _mlp_kernel,
        out_shape=jax.ShapeDtypeStruct((batch_pad, LANE), jnp.float32),
        grid_spec=pltpu.PrefetchScalarGridSpec(
            num_scalar_prefetch=1,
            grid=grid,
            in_specs=[
                # x: one (tb, K_PAD) tile per grid step.
                pl.BlockSpec((tb, K_PAD), lambda i, ind_ref: (i, 0)),
                # packed params: pick the head slab via the prefetched index.
                # Block index is grid-invariant -> DMA'd once, resident after.
                pl.BlockSpec((None, PROWS, LANE), lambda i, ind_ref: (ind_ref[0], 0, 0)),
            ],
            out_specs=pl.BlockSpec((tb, LANE), lambda i, ind_ref: (i, 0)),
        ),
        compiler_params=pltpu.CompilerParams(
            dimension_semantics=("parallel",),  # splits batch tiles across TCs on v7x
        ),
    )(ind_arr, x_pad, packed_params)

    # Slice off the zero padding outside the kernel (keeps stores lane-dense).
    return out_pad[:batch, :labelNum].astype(x.dtype)


# Whole forward (pad -> pallas_call -> slice) fused into one executable.
# `ind` is a traced scalar -> no recompile when switching heads.
testd_forward = jax.jit(_testd_forward_impl, static_argnames=("batch_tile",))


def init_params(key):
    """Deterministic init mirroring nn.Linear shapes (weights stored transposed)."""
    k1, k2, k3, k4, k5, k6 = jax.random.split(key, 6)

    def u(k, shape, fan_in):
        bound = 1.0 / (fan_in ** 0.5)
        return jax.random.uniform(k, shape, jnp.float32, -bound, bound)

    return {
        "fc1_w": u(k1, (inDim, hidDim), inDim),      # Linear(inDim, hidDim).weight^T
        "fc1_b": u(k2, (hidDim,), inDim),
        "fc2_w": u(k3, (hidDim, labelNum), hidDim),  # Linear(hidDim, labelNum).weight^T
        "fc2_b": u(k4, (labelNum,), hidDim),
        "fc3_w": u(k5, (hidDim, labelNum), hidDim),
        "fc3_b": u(k6, (labelNum,), hidDim),
    }


def pack_params(params):
    """One-time packing of all parameters into a (2, 176, 128) lane-aligned slab."""

    def head(wk, bk):
        slab = jnp.zeros((PROWS, LANE), jnp.float32)
        slab = slab.at[:inDim, :hidDim].set(params["fc1_w"])
        slab = slab.at[B1_ROW, :hidDim].set(params["fc1_b"])
        slab = slab.at[WK_OFF:WK_OFF + hidDim, :labelNum].set(wk)
        slab = slab.at[BK_ROW, :labelNum].set(bk)
        return slab

    return jnp.stack(
        [head(params["fc2_w"], params["fc2_b"]),
         head(params["fc3_w"], params["fc3_b"])],
        axis=0,
    )


def reference_forward(x, params, ind):
    h1 = jnp.maximum(x @ params["fc1_w"] + params["fc1_b"], 0.0)
    if ind == 0:
        return h1 @ params["fc2_w"] + params["fc2_b"]
    return h1 @ params["fc3_w"] + params["fc3_b"]


if __name__ == "__main__":
    key = jax.random.PRNGKey(0)
    kx, kp, kb = jax.random.split(key, 3)
    params = init_params(kp)
    packed = jax.block_until_ready(pack_params(params))

    ok = True

    # Small case matching the module spec (batch=2, inDim=20).
    x = jax.random.normal(kx, (batchSize, inDim), jnp.float32)
    for ind in (0, 1):
        out = jax.block_until_ready(testd_forward(x, packed, jnp.int32(ind)))
        ref = reference_forward(x, params, ind)
        ok &= out.shape == (batchSize, labelNum)
        ok &= bool(jnp.allclose(out, ref, atol=1e-5, rtol=1e-5))

    # Larger batch exercising the tiled "parallel" grid path (amortized launch).
    xb = jax.random.normal(kb, (1024, inDim), jnp.float32)
    for ind in (0, 1):
        out = jax.block_until_ready(testd_forward(xb, packed, jnp.int32(ind), batch_tile=256))
        ref = reference_forward(xb, params, ind)
        ok &= out.shape == (1024, labelNum)
        ok &= bool(jnp.allclose(out, ref, atol=1e-4, rtol=1e-4))

    if ok:
        print("KERNEL_OK")
</pallas_src>

<mosaic_0001>
module attributes {stable_mosaic.version = 11 : i64} {
  func.func @_mlp_kernel(%arg0: i32, %arg1: memref<1xi32, #tpu.memory_space<smem>>, %arg2: memref<8x32xf32, #tpu.memory_space<vmem>>, %arg3: memref<1x176x128xf32, #tpu.memory_space<vmem>>, %arg4: memref<8x128xf32, #tpu.memory_space<vmem>>) attributes {dimension_semantics = [#tpu.dimension_semantics<parallel>], iteration_bounds = array<i64: 1>, scalar_prefetch = 1 : i64, scratch_operands = 0 : i64, tpu.core_type = #tpu.core_type<tc>, window_params = [{transform_indices = @transform_0, window_bounds = array<i64: 8, 32>}, {transform_indices = @transform_1, window_bounds = array<i64: 1, 176, 128>}, {transform_indices = @transform_2, window_bounds = array<i64: 8, 128>}]} {
    %c0 = arith.constant 0 : index
    %c0_0 = arith.constant 0 : index
    %c0_1 = arith.constant 0 : index
    %0 = vector.load %arg3[%c0, %c0_0, %c0_1] : memref<1x176x128xf32, #tpu.memory_space<vmem>>, vector<1x32x128xf32>
    %1 = vector.shape_cast %0 : vector<1x32x128xf32> to vector<32x128xf32>
    %c0_2 = arith.constant 0 : index
    %c32 = arith.constant 32 : index
    %c0_3 = arith.constant 0 : index
    %2 = vector.load %arg3[%c0_2, %c32, %c0_3] : memref<1x176x128xf32, #tpu.memory_space<vmem>>, vector<1x1x128xf32>
    %3 = vector.shape_cast %2 : vector<1x1x128xf32> to vector<1x128xf32>
    %c0_4 = arith.constant 0 : index
    %c40 = arith.constant 40 : index
    %c0_5 = arith.constant 0 : index
    %4 = vector.load %arg3[%c0_4, %c40, %c0_5] : memref<1x176x128xf32, #tpu.memory_space<vmem>>, vector<1x128x128xf32>
    %5 = vector.shape_cast %4 : vector<1x128x128xf32> to vector<128x128xf32>
    %c0_6 = arith.constant 0 : index
    %c168 = arith.constant 168 : index
    %c0_7 = arith.constant 0 : index
    %6 = vector.load %arg3[%c0_6, %c168, %c0_7] : memref<1x176x128xf32, #tpu.memory_space<vmem>>, vector<1x1x128xf32>
    %7 = vector.shape_cast %6 : vector<1x1x128xf32> to vector<1x128xf32>
    %c0_8 = arith.constant 0 : index
    %c0_9 = arith.constant 0 : index
    %8 = vector.load %arg2[%c0_8, %c0_9] : memref<8x32xf32, #tpu.memory_space<vmem>>, vector<8x32xf32>
    %cst = arith.constant dense<0.000000e+00> : vector<8x128xf32>
    %9 = tpu.matmul %8, %1, %cst {dimension_numbers = #tpu.dot_dimension_numbers<[1], [0], [0], [1], [0, 0, 1, 1], [], []>} : vector<8x32xf32>, vector<32x128xf32>, vector<8x128xf32> -> vector<8x128xf32>
    %10 = vector.broadcast %3 : vector<1x128xf32> to vector<8x128xf32>
    %11 = arith.addf %9, %10 : vector<8x128xf32>
    %cst_10 = arith.constant 0.000000e+00 : f32
    %12 = vector.broadcast %cst_10 : f32 to vector<8x128xf32>
    %13 = arith.maximumf %11, %12 : vector<8x128xf32>
    %cst_11 = arith.constant dense<0.000000e+00> : vector<8x128xf32>
    %14 = tpu.matmul %13, %5, %cst_11 {dimension_numbers = #tpu.dot_dimension_numbers<[1], [0], [0], [1], [0, 0, 1, 1], [], []>} : vector<8x128xf32>, vector<128x128xf32>, vector<8x128xf32> -> vector<8x128xf32>
    %15 = vector.broadcast %7 : vector<1x128xf32> to vector<8x128xf32>
    %16 = arith.addf %14, %15 : vector<8x128xf32>
    %c0_12 = arith.constant 0 : index
    %c0_13 = arith.constant 0 : index
    %17 = vector.load %arg4[%c0_12, %c0_13] : memref<8x128xf32, #tpu.memory_space<vmem>>, vector<8x128xf32>
    tpu.vector_store %arg4[%c0_12, %c0_13], %16 {strides = array<i32>} : memref<8x128xf32, #tpu.memory_space<vmem>>, vector<8x128xf32>,
    return
  }
  func.func @transform_0(%arg0: i32, %arg1: memref<1xi32, #tpu.memory_space<smem>>) -> (i32, i32) {
    %c0_i32 = arith.constant 0 : i32
    %c0_i32_0 = arith.constant 0 : i32
    return %arg0, %c0_i32 : i32, i32
  }
  func.func @transform_1(%arg0: i32, %arg1: memref<1xi32, #tpu.memory_space<smem>>) -> (i32, i32, i32) {
    %c0 = arith.constant 0 : index
    %0 = memref.load %arg1[%c0] : memref<1xi32, #tpu.memory_space<smem>>
    %c0_i32 = arith.constant 0 : i32
    %c0_i32_0 = arith.constant 0 : i32
    %c0_i32_1 = arith.constant 0 : i32
    return %0, %c0_i32, %c0_i32_0 : i32, i32, i32
  }
  func.func @transform_2(%arg0: i32, %arg1: memref<1xi32, #tpu.memory_space<smem>>) -> (i32, i32) {
    %c0_i32 = arith.constant 0 : i32
    %c0_i32_0 = arith.constant 0 : i32
    return %arg0, %c0_i32 : i32, i32
  }
}

</mosaic_0001>

<bundles_post_ra>
// kernel: _testd_forward_impl.1
= control target key start
LH: loop header
LB: loop body
LE: loop exit
PB: predicated region body
PF: predicated region fallthrough
CT: control target
= control target key end

     0   :  { %9 = vsyncpa [#allocation5], 0  ;;  %s351_s15 = smov [#allocation4]   ;;  %s395_s0 = inlined_call_operand.<no memory space> [shape: s32[1], index: 0, kind: input, shape index: {}]   ;;  %s396_s1 = inlined_call_operand.vmem [shape: f32[8,32], index: 1, kind: input, shape index: {}]   ;;  %s397_s2 = inlined_call_operand.hbm [shape: f32[2,176,128], index: 2, kind: input, shape index: {}]   ;;  %s398_s3 = inlined_call_operand.vmem [shape: f32[8,128], index: 3, kind: output, shape index: {}]  }
   0x1   :  { %s318_s14 = smul.u32 2816, %s395_s0  ;;  %s21_s16 = sshll.u32 %s351_s15, 4  ;;  %s22_s16 = int_to_ptr.vmem [resolvable:$true] %s21_s16 }
   0x2   :  { %s327_s23 = scalar_lea.hbm %s397_s2, 5632 }
   0x3   :  { %s20_s19 = scalar_lea.hbm %s397_s2, %s318_s14 }
   0x4   :  { %s325_s20 = scalar_lea.hbm %s20_s19, 2816  ;;  %p328_p1 = scmp.lt.u32.totalorder %s20_s19, %s397_s2 }
   0x5   :  { %p326_p0 = scmp.ne.s32.totalorder %s20_s19, %s325_s20  ;;  %p329_p2 = scmp.lt.u32.totalorder %s327_s23, %s325_s20 }
   0x6   :  { %p331_p4 = scmp.lt.u32.totalorder %s325_s20, %s20_s19 }
   0x7   :  { %p330_p3 = por %p329_p2, %p328_p1 }
   0x9   :  { %p332_p5 = por %p331_p4, %p330_p3 }
   0xb   :  { %p333_p6 = pnand %p332_p5, %p326_p0 }
   0xd   :  { %336 = shalt.err (!%p333_p6)
}
   0xe   :  { %s337_s0 = scalar_lea.vmem %s22_s16, 2816  ;;  %p342_p8 = scmp.lt.s32.totalorder %s22_s16, %s22_s16 }
   0xf   :  { %p338_p7 = scmp.ne.s32.totalorder %s22_s16, %s337_s0  ;;  %p343_p9 = scmp.lt.s32.totalorder %s337_s0, %s337_s0 }
  0x11   :  { %p344_p10 = por %p343_p9, %p342_p8 }
  0x13   :  { %p345_p11 = pnand %p344_p10, %p338_p7 }
  0x15   :  { %348 = shalt.err (!%p345_p11)
}
  0x16   :  { %s352_s26 = smov 128   ;;  %s353_s27 = smov 8  }
  0x17   :  { %27 = dma.hbm_to_vmem [thread:$0]  %s20_s19, 2816, %s22_s16, [#allocation5], %s352_s26, %s352_s26, %s353_s27  }
  0x18   :  { %349 = dma.done.wait [#allocation5], 2816  }
  0x19   :  { %350 = vsyncadd [#allocation5], 4294964480  ;;  %v354_v0 = vmov 0.0|0.0   ;;  %vm355_vm0 = vmmov 0   ;;  %v356_v1 = vmov 0.0   ;;  %v32_v2 = vld [vmem:[#allocation4] sm:$0xff] }
  0x1a   :  { %288 = vmatprep.subr.bf16.mxu0 %v354_v0  ;;  %250 = vmatprep.mubr.msk.f32.mxu0 %vm355_vm0, %v356_v1  ;;  %v33_v3 = vld [vmem:[#allocation4 + $0x8] sm:$0xff]  ;;  %v34_v4 = vld [vmem:[#allocation4 + $0x10] sm:$0xff]  ;;  %v35_v6 = vld [vmem:[#allocation4 + $0x18] sm:$0xff]  ;;  %vm59_vm1 = vcmask 261120  }
  0x1b   :  { %294 = vmatprep.subr.bf16.mxu1 %v354_v0  ;;  %285 = vmatprep.mubr.msk.f32.mxu1 %vm355_vm0, %v356_v1  ;;  %v289_v5 = vpack.c.bf16 %v33_v3, %v32_v2  ;;  %v37_v7 = vld [vmem:[#allocation4 + $0x28] sm:$0xff]  ;;  %v38_v8 = vld [vmem:[#allocation4 + $0x30] sm:$0xff]  ;;  %v39_v9 = vld [vmem:[#allocation4 + $0x38] sm:$0xff]  ;;  %v292_v11 = vpack.c.bf16 %v35_v6, %v34_v4 }
  0x1c   :  { %v40_v10 = vld [vmem:[#allocation4 + $0x40] sm:$0xff]  ;;  %v295_v12 = vpack.c.bf16 %v38_v8, %v37_v7  ;;  %v41_v14 = vld [vmem:[#allocation4 + $0x48] sm:$0xff]  ;;  %v42_v15 = vld [vmem:[#allocation4 + $0x50] sm:$0xff] }
  0x1d   :  { %290 = vmatpush3.bf16.msra.mxu0 %v289_v5  ;;  %v298_v13 = vpack.c.bf16 %v40_v10, %v39_v9  ;;  %v54_v16 = vld [vmem:[%s396_s1] sm:$0xff]  ;;  %v301_v17 = vpack.c.bf16 %v42_v15, %v41_v14  ;;  %v43_v18 = vld [vmem:[#allocation4 + $0x58] sm:$0xff]  ;;  %v45_v21 = vld [vmem:[#allocation4 + $0x68] sm:$0xff] }
  0x1e   :  { %291 = vmatprep.subr.bf16.mxu0 %v354_v0  ;;  %296 = vmatpush3.bf16.msra.mxu1 %v295_v12  ;;  %v44_v19 = vld [vmem:[#allocation4 + $0x60] sm:$0xff]  ;;  %v46_v22 = vld [vmem:[#allocation4 + $0x70] sm:$0xff]  ;;  %v47_v24 = vld [vmem:[#allocation4 + $0x78] sm:$0xff] }
  0x1f   :  { %297 = vmatprep.subr.bf16.mxu1 %v354_v0  ;;  %v304_v20 = vpack.c.bf16 %v44_v19, %v43_v18  ;;  %v307_v23 = vpack.c.bf16 %v46_v22, %v45_v21  ;;  %v48_v25 = vld [vmem:[#allocation4 + $0x80] sm:$0xff]  ;;  %v49_v27 = vld [vmem:[#allocation4 + $0x88] sm:$0xff]  ;;  %v50_v28 = vld [vmem:[#allocation4 + $0x90] sm:$0xff] }
  0x20   :  { %v310_v26 = vpack.c.bf16 %v48_v25, %v47_v24  ;;  %v313_v29 = vpack.c.bf16 %v50_v28, %v49_v27  ;;  %v51_v30 = vld [vmem:[#allocation4 + $0x98] sm:$0xff]  ;;  %v52_v31 = vld [vmem:[#allocation4 + $0xa0] sm:$0xff]  ;;  %v219_v38 = vld [vmem:[#allocation4 + $0xa8] ss:$0 sm:$0xff] }
  0x21   :  { %293 = vmatpush3.bf16.msra.mxu0 %v292_v11  ;;  %v316_v32 = vpack.c.bf16 %v52_v31, %v51_v30  ;;  %v217_v33 = vld [vmem:[#allocation4 + $0x20] ss:$0 sm:$0xff] }
  0x22   :  { %299 = vmatpush3.bf16.msra.mxu1 %v298_v13 }
  0x23   :  { %300 = vmatprep.subr.bf16.mxu1 %v354_v0 }
  0x24   :  { %251 = vmatmul.mubr.msk.f32.vlgmr.msra.gmra.mrb[0].mxu0 %vm59_vm1, %v54_v16 }
  0x26   :  { %302 = vmatpush3.bf16.msra.mxu1 %v301_v17 }
  0x27   :  { %303 = vmatprep.subr.bf16.mxu1 %v354_v0 }
  0x2a   :  { %305 = vmatpush3.bf16.msra.mxu1 %v304_v20 }
  0x2b   :  { %306 = vmatprep.subr.bf16.mxu1 %v354_v0 }
  0x2e   :  { %308 = vmatpush3.bf16.msra.mxu1 %v307_v23 }
  0x2f   :  { %309 = vmatprep.subr.bf16.mxu1 %v354_v0 }
  0x32   :  { %311 = vmatpush3.bf16.msra.mxu1 %v310_v26 }
  0x33   :  { %312 = vmatprep.subr.bf16.mxu1 %v354_v0 }
  0x36   :  { %314 = vmatpush3.bf16.msra.mxu1 %v313_v29 }
  0x37   :  { %315 = vmatprep.subr.bf16.mxu1 %v354_v0 }
  0x3a   :  { %317 = vmatpush3.bf16.msra.mxu1 %v316_v32 }
  0xf7   :  { %v129_v34 = vpop.f32.mrb[0].mxu0 }
  0xf8   :  { %v130_v35 = vadd.f32 %v217_v33, %v129_v34  ;;  %v252_v36 = vpop.f32.mrb[1].mxu0 }
  0xfa   :  { %v133_v37 = vmax.f32 %v130_v35, 0.0 }
  0xfc   :  { %286 = vmatmul.mubr.f32.vlgmr.msra.gmra.mrb[0].mxu1 %v133_v37 }
 0x1cf   :  { %v204_v39 = vpop.f32.mrb[0].mxu1 }
 0x1d0   :  { %v205_v40 = vadd.f32 %v219_v38, %v204_v39  ;;  %v287_v41 = vpop.f32.mrb[1].mxu1 }
 0x1d2   :  { %208 = vst [vmem:[%s398_s3] sm:$0xff] %v205_v40 }
 0x1d3   :  { %213 = vsyncpa [#allocation5], 1 }

</bundles_post_ra>
